<compile_context>
chip_gen: v5e
topology: v5e:2x2
jax: 0.10.0
libtpu: 0.0.40
codegen_flags: <defaults>
</compile_context>

<pallas_src>
import functools
import math

import jax
import jax.numpy as jnp
from jax.experimental import pallas as pl
from jax.experimental.pallas import tpu as pltpu


# ----------------------------------------------------------------------------
# Pallas kernel: identity copy (the entire forward-pass compute of VGG16fcn).
# ----------------------------------------------------------------------------
def _identity_kernel(x_ref, o_ref):
    # Whole-tile copy: load the VMEM block and store it to the output block.
    o_ref[...] = x_ref[...]


def _identity_pallas_2d(x2d, tile_rows):
    """Copy a [rows, lanes] slab through a tiled, aliased Pallas kernel."""
    rows, lanes = x2d.shape
    itemsize = jnp.dtype(x2d.dtype).itemsize
    assert lanes % 128 == 0 and rows % tile_rows == 0

    tile_bytes = tile_rows * lanes * itemsize
    # Double-buffered input + output blocks (4 * tile) plus headroom; clamp so
    # we never ask for more than is reasonable on v7x (64 MiB physical).
    vmem_limit = min(48 << 20, max(16 << 20, 4 * tile_bytes + (4 << 20)))

    grid = (rows // tile_rows,)
    return pl.pallas_call(
        _identity_kernel,
        out_shape=jax.ShapeDtypeStruct((rows, lanes), x2d.dtype),
        grid_spec=pltpu.PrefetchScalarGridSpec(
            num_scalar_prefetch=0,
            grid=grid,
            in_specs=[pl.BlockSpec((tile_rows, lanes), lambda i: (i, 0))],
            out_specs=pl.BlockSpec((tile_rows, lanes), lambda i: (i, 0)),
        ),
        input_output_aliases={0: 0},
        compiler_params=pltpu.CompilerParams(
            dimension_semantics=("parallel",),
            vmem_limit_bytes=vmem_limit,
        ),
        cost_estimate=pl.CostEstimate(
            flops=0,
            transcendentals=0,
            bytes_accessed=2 * rows * lanes * itemsize,
        ),
    )(x2d)


def _choose_layout(n, dtype):
    """Pick (padded_rows, lanes, tile_rows) for a flat array of n elements."""
    itemsize = jnp.dtype(dtype).itemsize
    # Sublane packing: 8 rows for 32-bit, 16 for 16-bit, 32 for 8-bit dtypes.
    sublane = 8 * max(1, 4 // itemsize)

    # Lane-dense last dim: prefer 1024 lanes when the array is big enough,
    # otherwise fall back to the minimal 128-lane layout to limit padding.
    lanes = 1024 if n >= sublane * 1024 else 128

    # Target ~4 MiB per block (safe with double-buffered in+out on v7x's
    # smaller scoped VMEM; still large enough to sit at HBM roofline on
    # v5e/v6e — extra depth cannot help a bandwidth-bound copy).
    target_tile_bytes = 4 << 20
    max_tile_rows = max(
        sublane, (target_tile_bytes // (lanes * itemsize)) // sublane * sublane
    )

    rows_needed = -(-n // lanes)                       # ceil(n / lanes)
    rows_needed = -(-rows_needed // sublane) * sublane  # round up to sublane
    tile_rows = min(max_tile_rows, rows_needed)
    rows = -(-rows_needed // tile_rows) * tile_rows     # round up to tile
    return rows, lanes, tile_rows


@functools.partial(jax.jit, static_argnums=(1, 2, 3))
def _identity_forward(x, rows, lanes, tile_rows):
    orig_shape = x.shape
    n = x.size
    flat = x.reshape(-1)
    padded = rows * lanes
    if padded != n:  # only pad when not already tile-aligned
        flat = jnp.pad(flat, (0, padded - n))
    x2d = flat.reshape(rows, lanes)
    y2d = _identity_pallas_2d(x2d, tile_rows)
    y = y2d.reshape(-1)
    if padded != n:
        y = y[:n]
    return y.reshape(orig_shape)


# ----------------------------------------------------------------------------
# VGG16fcn module (JAX / Pallas version).
# ----------------------------------------------------------------------------
class VGG16fcnPallas:
    def __init__(self, key):
        # The original module stores orig_vggnet.features (13 conv layers of
        # VGG16), but forward() never uses them.  We still materialize the
        # parameter shapes deterministically so the module mirrors __init__.
        cfg_in = [3, 64, 64, 128, 128, 256, 256, 256, 512, 512, 512, 512, 512]
        cfg_out = [64, 64, 128, 128, 256, 256, 256, 512, 512, 512, 512, 512, 512]
        self.feature_params = []
        for cin, cout in zip(cfg_in, cfg_out):
            key, wk, bk = jax.random.split(key, 3)
            fan_in = cin * 3 * 3
            bound = 1.0 / math.sqrt(fan_in)
            w = jax.random.uniform(
                wk, (cout, cin, 3, 3), jnp.float32, -bound, bound
            )
            b = jax.random.uniform(bk, (cout,), jnp.float32, -bound, bound)
            self.feature_params.append((w, b))
        # TODO(synk): self.features is never invoked in forward(), so the conv
        # weights above are unused (matching the reference semantics exactly).

    def forward(self, x, return_feature_maps=False):
        # Reference forward returns [x] on BOTH branches — identity via Pallas.
        n = 1
        for d in x.shape:
            n *= int(d)
        rows, lanes, tile_rows = _choose_layout(n, x.dtype)
        y = _identity_forward(x, rows, lanes, tile_rows)
        if return_feature_maps:
            return [y]
        else:
            return [y]


if __name__ == "__main__":
    key = jax.random.PRNGKey(0)
    key, xkey = jax.random.split(key)

    # Small input consistent with an NCHW image batch.
    x = jax.random.normal(xkey, (2, 4, 16, 16), dtype=jnp.float32)

    model = VGG16fcnPallas(key)
    out = model.forward(x, return_feature_maps=False)

    y = jax.block_until_ready(out[0])

    assert isinstance(out, list) and len(out) == 1
    assert y.shape == x.shape and y.dtype == x.dtype
    assert bool(jnp.allclose(y, x))

    print("KERNEL_OK")
</pallas_src>

<mosaic_0001>
module attributes {stable_mosaic.version = 11 : i64} {
  func.func @_identity_kernel(%arg0: i32, %arg1: memref<16x128xf32, #tpu.memory_space<vmem>>, %arg2: memref<16x128xf32, #tpu.memory_space<vmem>>) attributes {dimension_semantics = [#tpu.dimension_semantics<parallel>], iteration_bounds = array<i64: 1>, scalar_prefetch = 0 : i64, scratch_operands = 0 : i64, tpu.core_type = #tpu.core_type<tc>, window_params = [{transform_indices = @transform_0, window_bounds = array<i64: 16, 128>}, {transform_indices = @transform_1, window_bounds = array<i64: 16, 128>}]} {
    %c0 = arith.constant 0 : index
    %c0_0 = arith.constant 0 : index
    %0 = vector.load %arg1[%c0, %c0_0] : memref<16x128xf32, #tpu.memory_space<vmem>>, vector<16x128xf32>
    %c0_1 = arith.constant 0 : index
    %c0_2 = arith.constant 0 : index
    %1 = vector.load %arg2[%c0_1, %c0_2] : memref<16x128xf32, #tpu.memory_space<vmem>>, vector<16x128xf32>
    tpu.vector_store %arg2[%c0_1, %c0_2], %0 {strides = array<i32>} : memref<16x128xf32, #tpu.memory_space<vmem>>, vector<16x128xf32>,
    return
  }
  func.func @transform_0(%arg0: i32) -> (i32, i32) {
    %c0_i32 = arith.constant 0 : i32
    %c0_i32_0 = arith.constant 0 : i32
    return %arg0, %c0_i32 : i32, i32
  }
  func.func @transform_1(%arg0: i32) -> (i32, i32) {
    %c0_i32 = arith.constant 0 : i32
    %c0_i32_0 = arith.constant 0 : i32
    return %arg0, %c0_i32 : i32, i32
  }
}

</mosaic_0001>

<bundles_post_ra>
// kernel: _identity_forward.1
= control target key start
LH: loop header
LB: loop body
LE: loop exit
PB: predicated region body
PF: predicated region fallthrough
CT: control target
= control target key end

     0   :  { %s38_s0 = inlined_call_operand.vmem [shape: f32[16,128], index: 0, kind: input, shape index: {}, may-alias: {0,1}]   ;;  %s39_s1 = inlined_call_operand.vmem [shape: f32[16,128], index: 1, kind: output, shape index: {}, may-alias: {0,1}]  }
   0x1   :  { %v8_v0 = vld [vmem:[%s38_s0] sm:$0xff]  ;;  %v9_v1 = vld [vmem:[%s38_s0 + $0x8] sm:$0xff] }
   0x2   :  { %10 = vst [vmem:[%s39_s1] sm:$0xff] %v8_v0 }
   0x3   :  { %11 = vst [vmem:[%s39_s1 + $0x8] sm:$0xff] %v9_v1 }

</bundles_post_ra>
